<compile_context>
chip_gen: v5e
topology: v5e:2x2
jax: 0.10.0
libtpu: 0.0.40
codegen_flags: <defaults>
</compile_context>

<pallas_src>
import math

import jax
import jax.numpy as jnp
from jax.experimental import pallas as pl
from jax.experimental.pallas import tpu as pltpu

_MIB = 1024 * 1024


# ----------------------------------------------------------------------------
# Kernels
# ----------------------------------------------------------------------------

def _bottleneck_kernel(x_ref, w_ref, b_ref, eps_ref, z_ref):
    """One (tm, D) row tile: fused linear -> split -> reparameterize."""
    D = z_ref.shape[-1]
    Dp = w_ref.shape[-1] // 2
    # Fused linear: y = x @ [W_mu^T | W_ls^T] + [b_mu | b_ls]  -> (tm, 2*Dp)
    y = jnp.dot(x_ref[...], w_ref[...], preferred_element_type=jnp.float32)
    y = y + b_ref[...].astype(jnp.float32)
    mu = y[:, :D]                       # lane-aligned for D multiple of 128
    log_sigma = y[:, Dp:Dp + D]         # split point Dp is a lane boundary
    z = mu + jnp.exp(log_sigma) * eps_ref[...].astype(jnp.float32)
    z_ref[...] = z.astype(z_ref.dtype)


def _bottleneck_stats_kernel(x_ref, w_ref, b_ref, eps_ref, z_ref, mu_ref, ls_ref):
    """Same as above, additionally emitting mu / log_sigma (for kl_prior)."""
    D = z_ref.shape[-1]
    Dp = w_ref.shape[-1] // 2
    y = jnp.dot(x_ref[...], w_ref[...], preferred_element_type=jnp.float32)
    y = y + b_ref[...].astype(jnp.float32)
    mu = y[:, :D]
    log_sigma = y[:, Dp:Dp + D]
    mu_ref[...] = mu.astype(mu_ref.dtype)
    ls_ref[...] = log_sigma.astype(ls_ref.dtype)
    z = mu + jnp.exp(log_sigma) * eps_ref[...].astype(jnp.float32)
    z_ref[...] = z.astype(z_ref.dtype)


# ----------------------------------------------------------------------------
# Tiling helpers / pallas_call wrapper
# ----------------------------------------------------------------------------

def _round_up(v, m):
    return ((v + m - 1) // m) * m


def _choose_tm(M, Dp, per_row_bytes):
    """Row-tile size: as large as the VMEM budget allows (amortizes ~0.35us
    per grid step against v7x's ~3.2 TB/s HBM), rounded to MXU/sublane
    friendly granularity.  Single step for small M; otherwise an even number
    of steps so v7x's two TensorCores split the parallel axis evenly."""
    cap = 4096 if Dp <= 256 else 2048
    tm_max = min(cap, max(16, (24 * _MIB) // max(1, per_row_bytes)))
    if tm_max >= 512:
        tm_max = (tm_max // 256) * 256
    else:
        tm_max = (tm_max // 16) * 16
    if M <= tm_max:
        return M                       # one step; block == full array dim
    steps = pl.cdiv(M, tm_max)
    if steps % 2:
        steps += 1                     # even step count for the 2-TC v7x split
    return min(tm_max, _round_up(pl.cdiv(M, steps), 16))


def _forward_pallas(x2d, w_fused, b_fused, eps2d, out_dtype, want_stats):
    M, D = x2d.shape
    Do = w_fused.shape[1]              # 2 * Dp (lane-padded output width)
    Dp = Do // 2
    x_item = x2d.dtype.itemsize
    out_item = jnp.dtype(out_dtype).itemsize

    # Bytes of VMEM per row: double-buffered streamed tiles (x, eps, z[, mu, ls])
    # plus the f32 (tm, 2*Dp) matmul intermediate and a f32 z temp.
    stream_per_row = 2 * x_item + out_item + (8 if want_stats else 0)
    per_row = 2 * D * stream_per_row + 4 * (2 * Dp + 2 * D)
    tm = _choose_tm(M, Dp, per_row)

    w_bytes = w_fused.size * w_fused.dtype.itemsize
    b_bytes = b_fused.size * b_fused.dtype.itemsize
    est = 2 * (w_bytes + b_bytes) + tm * per_row + 2 * _MIB
    vmem_limit = int(min(48 * _MIB, max(16 * _MIB, (est * 5) // 4)))

    in_specs = [
        pl.BlockSpec((tm, D), lambda i: (i, 0)),    # x rows (no lane padding)
        pl.BlockSpec((D, Do), lambda i: (0, 0)),    # fused W^T (grid-invariant)
        pl.BlockSpec((1, Do), lambda i: (0, 0)),    # fused bias (grid-invariant)
        pl.BlockSpec((tm, D), lambda i: (i, 0)),    # eps rows
    ]
    if want_stats:
        kernel = _bottleneck_stats_kernel
        out_shape = (jax.ShapeDtypeStruct((M, D), out_dtype),
                     jax.ShapeDtypeStruct((M, D), jnp.float32),
                     jax.ShapeDtypeStruct((M, D), jnp.float32))
        out_specs = (pl.BlockSpec((tm, D), lambda i: (i, 0)),
                     pl.BlockSpec((tm, D), lambda i: (i, 0)),
                     pl.BlockSpec((tm, D), lambda i: (i, 0)))
    else:
        kernel = _bottleneck_kernel
        out_shape = jax.ShapeDtypeStruct((M, D), out_dtype)
        out_specs = pl.BlockSpec((tm, D), lambda i: (i, 0))

    return pl.pallas_call(
        kernel,
        out_shape=out_shape,
        grid_spec=pltpu.PrefetchScalarGridSpec(
            num_scalar_prefetch=0,
            grid=(pl.cdiv(M, tm),),
            in_specs=in_specs,
            out_specs=out_specs,
        ),
        compiler_params=pltpu.CompilerParams(
            dimension_semantics=("parallel",),
            vmem_limit_bytes=vmem_limit),
    )(x2d, w_fused, b_fused, eps2d)


# ----------------------------------------------------------------------------
# Module
# ----------------------------------------------------------------------------

class BottleneckPallas:
    """JAX/Pallas port of the PyTorch Bottleneck module."""

    def __init__(self, dim_latent=128, *, key=None, param_dtype=jnp.float32):
        if key is None:
            key = jax.random.PRNGKey(0)
        kw, kb = jax.random.split(key)
        D = dim_latent
        self.dim_latent = D
        # nn.Linear(dim_latent, 2*dim_latent): weight (2D, D), bias (2D,)
        bound = 1.0 / math.sqrt(D)
        self.weight = jax.random.uniform(kw, (2 * D, D), param_dtype, -bound, bound)
        self.bias = jax.random.uniform(kb, (2 * D,), param_dtype, -bound, bound)
        self._saved_for_later = {}

        # Precompute (once) the fused / transposed operand the kernel consumes.
        # Only the OUTPUT dim is lane-padded (to 2*Dp), so the streamed x / eps
        # stay at width D and the mu / log_sigma split lands on a lane boundary:
        #   columns [0, D)        -> mu weights
        #   columns [Dp, Dp + D)  -> log_sigma weights
        Dp = _round_up(D, 128)
        self._Dp = Dp
        w_t = self.weight.T                                     # (D, 2D)
        w_fused = jnp.zeros((D, 2 * Dp), param_dtype)
        w_fused = w_fused.at[:, :D].set(w_t[:, :D])             # mu block
        w_fused = w_fused.at[:, Dp:Dp + D].set(w_t[:, D:])      # log_sigma block
        b_fused = jnp.zeros((1, 2 * Dp), param_dtype)
        b_fused = b_fused.at[0, :D].set(self.bias[:D])
        b_fused = b_fused.at[0, Dp:Dp + D].set(self.bias[D:])
        self._w_fused = w_fused
        self._b_fused = b_fused

    def save_for_later(self, **kwargs):
        self._saved_for_later.update(kwargs)

    def forward(self, x, dim=-1, *, noise=None, key=None, seed=0, save_stats=False):
        """x: any-rank array whose `dim` axis has size dim_latent.
        noise: optional, SAME shape/layout as x (like torch.randn_like(x)).
        If None, noise is drawn from `key` (or PRNGKey(seed)) in the wrapper.
        Fast path is dim == -1 (no transposed HBM copy)."""
        self._saved_for_later.clear()
        D = self.dim_latent
        ndim = x.ndim
        dim = dim % ndim

        # NOTE: for dim != -1 this materializes a transposed copy in HBM
        # (documented trade-off; fold into the index_map if it ever dominates).
        xt = jnp.swapaxes(x, dim, ndim - 1)
        lead_shape = xt.shape[:-1]
        assert xt.shape[-1] == D
        M = math.prod(lead_shape) if lead_shape else 1
        x2d = xt.reshape(M, D)                       # keep caller dtype in HBM

        if noise is None:
            if key is None:
                key = jax.random.PRNGKey(seed)
            eps2d = jax.random.normal(key, (M, D), dtype=x2d.dtype)
        else:
            # noise has the same layout as x: apply the SAME transpose so the
            # deterministic path matches the reference exactly.
            eps2d = jnp.swapaxes(noise, dim, ndim - 1).reshape(M, D)

        out_dtype = x.dtype
        if save_stats:
            z2d, mu2d, ls2d = _forward_pallas(
                x2d, self._w_fused, self._b_fused, eps2d, out_dtype, True)
            self.save_for_later(mu=mu2d.reshape(*lead_shape, D),
                                log_sigma=ls2d.reshape(*lead_shape, D))
        else:
            z2d = _forward_pallas(
                x2d, self._w_fused, self._b_fused, eps2d, out_dtype, False)

        z = z2d.reshape(*lead_shape, D)
        return jnp.swapaxes(z, dim, ndim - 1)        # transpose back

    @property
    def kl_prior(self):
        mu = self._saved_for_later["mu"]
        ls = self._saved_for_later["log_sigma"]
        return -0.5 * jnp.sum(1.0 + 2.0 * ls - mu ** 2 - jnp.exp(2.0 * ls))


# ----------------------------------------------------------------------------
# Pure-JAX reference + self-test
# ----------------------------------------------------------------------------

def _reference_forward(module, x, noise, dim=-1):
    ndim = x.ndim
    dim = dim % ndim
    xt = jnp.swapaxes(x, dim, ndim - 1).astype(jnp.float32)
    y = jnp.dot(xt, module.weight.T.astype(jnp.float32),
                precision=jax.lax.Precision.HIGHEST) + module.bias.astype(jnp.float32)
    D = module.dim_latent
    mu, log_sigma = y[..., :D], y[..., D:]
    eps = jnp.swapaxes(noise, dim, ndim - 1).astype(jnp.float32)
    z = mu + jnp.exp(log_sigma) * eps
    return jnp.swapaxes(z, dim, ndim - 1), mu, log_sigma


if __name__ == "__main__":
    key = jax.random.PRNGKey(0)
    (k_x, k_eps, k_params, k_x2, k_eps2, k_params2,
     k_xt, k_epst, k_rng) = jax.random.split(key, 9)

    # ---- default latent width (D = 128, lane-dense) ----
    dim_latent = 128
    batch, seq = 2, 8
    x = jax.random.normal(k_x, (batch, seq, dim_latent), jnp.float32)
    noise = jax.random.normal(k_eps, x.shape, jnp.float32)   # randn_like surrogate

    module = BottleneckPallas(dim_latent=dim_latent, key=k_params)

    # 1) Deterministic path (explicit eps), with stats: check z and kl_prior.
    z = jax.block_until_ready(module.forward(x, dim=-1, noise=noise, save_stats=True))
    z_ref, mu_ref, ls_ref = _reference_forward(module, x, noise, dim=-1)
    assert z.shape == x.shape
    assert jnp.allclose(z, z_ref, atol=2e-3, rtol=2e-3), "mismatch vs reference"
    kl = module.kl_prior
    kl_ref = -0.5 * jnp.sum(1.0 + 2.0 * ls_ref - mu_ref ** 2 - jnp.exp(2.0 * ls_ref))
    assert jnp.allclose(kl, kl_ref, rtol=5e-3, atol=1e-2), (float(kl), float(kl_ref))

    # 2) Default path (eps drawn from an explicit key in the wrapper): exact
    #    check by reproducing the same noise outside.
    M = batch * seq
    z_rng = jax.block_until_ready(module.forward(x, dim=-1, key=k_rng))
    eps_exp = jax.random.normal(k_rng, (M, dim_latent), jnp.float32).reshape(x.shape)
    z_rng_ref, _, _ = _reference_forward(module, x, eps_exp, dim=-1)
    assert z_rng.shape == x.shape
    assert bool(jnp.all(jnp.isfinite(z_rng)))
    assert jnp.allclose(z_rng, z_rng_ref, atol=2e-3, rtol=2e-3), "mismatch (rng path)"

    # ---- small latent width (D = 32): no wrapper padding, masked-vst output ----
    dim_small = 32
    x_s = jax.random.normal(k_x2, (batch, seq, dim_small), jnp.float32)
    noise_s = jax.random.normal(k_eps2, x_s.shape, jnp.float32)
    module_s = BottleneckPallas(dim_latent=dim_small, key=k_params2)
    z_s = jax.block_until_ready(module_s.forward(x_s, dim=-1, noise=noise_s))
    z_s_ref, _, _ = _reference_forward(module_s, x_s, noise_s, dim=-1)
    assert z_s.shape == x_s.shape
    assert jnp.allclose(z_s, z_s_ref, atol=2e-3, rtol=2e-3), "mismatch (small D)"

    # ---- dim != -1: transpose path ----
    x_t = jax.random.normal(k_xt, (batch, dim_latent, 6), jnp.float32)
    noise_t = jax.random.normal(k_epst, x_t.shape, jnp.float32)
    z_t = jax.block_until_ready(module.forward(x_t, dim=1, noise=noise_t))
    z_t_ref, _, _ = _reference_forward(module, x_t, noise_t, dim=1)
    assert z_t.shape == x_t.shape
    assert jnp.allclose(z_t, z_t_ref, atol=2e-3, rtol=2e-3), "mismatch (dim=1)"

    print("KERNEL_OK")
</pallas_src>

<mosaic_0001>
module attributes {stable_mosaic.version = 11 : i64} {
  func.func @_bottleneck_stats_kernel(%arg0: i32, %arg1: memref<16x128xf32, #tpu.memory_space<vmem>>, %arg2: memref<128x256xf32, #tpu.memory_space<vmem>>, %arg3: memref<1x256xf32, #tpu.memory_space<vmem>>, %arg4: memref<16x128xf32, #tpu.memory_space<vmem>>, %arg5: memref<16x128xf32, #tpu.memory_space<vmem>>, %arg6: memref<16x128xf32, #tpu.memory_space<vmem>>, %arg7: memref<16x128xf32, #tpu.memory_space<vmem>>) attributes {dimension_semantics = [#tpu.dimension_semantics<parallel>], iteration_bounds = array<i64: 1>, scalar_prefetch = 0 : i64, scratch_operands = 0 : i64, tpu.core_type = #tpu.core_type<tc>, window_params = [{transform_indices = @transform_0, window_bounds = array<i64: 16, 128>}, {pipeline_mode = #tpu.pipeline_mode<synchronous>, transform_indices = @transform_1, window_bounds = array<i64: 128, 256>}, {pipeline_mode = #tpu.pipeline_mode<synchronous>, transform_indices = @transform_2, window_bounds = array<i64: 1, 256>}, {transform_indices = @transform_3, window_bounds = array<i64: 16, 128>}, {transform_indices = @transform_4, window_bounds = array<i64: 16, 128>}, {transform_indices = @transform_5, window_bounds = array<i64: 16, 128>}, {transform_indices = @transform_6, window_bounds = array<i64: 16, 128>}]} {
    %c0 = arith.constant 0 : index
    %c0_0 = arith.constant 0 : index
    %0 = vector.load %arg1[%c0, %c0_0] : memref<16x128xf32, #tpu.memory_space<vmem>>, vector<16x128xf32>
    %c0_1 = arith.constant 0 : index
    %c0_2 = arith.constant 0 : index
    %1 = vector.load %arg2[%c0_1, %c0_2] : memref<128x256xf32, #tpu.memory_space<vmem>>, vector<128x256xf32>
    %cst = arith.constant dense<0.000000e+00> : vector<16x256xf32>
    %2 = tpu.matmul %0, %1, %cst {dimension_numbers = #tpu.dot_dimension_numbers<[1], [0], [0], [1], [0, 0, 1, 1], [], []>} : vector<16x128xf32>, vector<128x256xf32>, vector<16x256xf32> -> vector<16x256xf32>
    %c0_3 = arith.constant 0 : index
    %c0_4 = arith.constant 0 : index
    %3 = vector.load %arg3[%c0_3, %c0_4] : memref<1x256xf32, #tpu.memory_space<vmem>>, vector<1x256xf32>
    %4 = vector.broadcast %3 : vector<1x256xf32> to vector<16x256xf32>
    %5 = arith.addf %2, %4 : vector<16x256xf32>
    %6 = vector.extract_strided_slice %5 {offsets = [0, 0], sizes = [16, 128], strides = [1, 1]} : vector<16x256xf32> to vector<16x128xf32>
    %7 = vector.extract_strided_slice %5 {offsets = [0, 128], sizes = [16, 128], strides = [1, 1]} : vector<16x256xf32> to vector<16x128xf32>
    %c0_5 = arith.constant 0 : index
    %c0_6 = arith.constant 0 : index
    %8 = vector.load %arg6[%c0_5, %c0_6] : memref<16x128xf32, #tpu.memory_space<vmem>>, vector<16x128xf32>
    tpu.vector_store %arg6[%c0_5, %c0_6], %6 {strides = array<i32>} : memref<16x128xf32, #tpu.memory_space<vmem>>, vector<16x128xf32>,
    %c0_7 = arith.constant 0 : index
    %c0_8 = arith.constant 0 : index
    %9 = vector.load %arg7[%c0_7, %c0_8] : memref<16x128xf32, #tpu.memory_space<vmem>>, vector<16x128xf32>
    tpu.vector_store %arg7[%c0_7, %c0_8], %7 {strides = array<i32>} : memref<16x128xf32, #tpu.memory_space<vmem>>, vector<16x128xf32>,
    %10 = math.exp %7 : vector<16x128xf32>
    %c0_9 = arith.constant 0 : index
    %c0_10 = arith.constant 0 : index
    %11 = vector.load %arg4[%c0_9, %c0_10] : memref<16x128xf32, #tpu.memory_space<vmem>>, vector<16x128xf32>
    %12 = arith.mulf %10, %11 : vector<16x128xf32>
    %13 = arith.addf %6, %12 : vector<16x128xf32>
    %c0_11 = arith.constant 0 : index
    %c0_12 = arith.constant 0 : index
    %14 = vector.load %arg5[%c0_11, %c0_12] : memref<16x128xf32, #tpu.memory_space<vmem>>, vector<16x128xf32>
    tpu.vector_store %arg5[%c0_11, %c0_12], %13 {strides = array<i32>} : memref<16x128xf32, #tpu.memory_space<vmem>>, vector<16x128xf32>,
    return
  }
  func.func @transform_0(%arg0: i32) -> (i32, i32) {
    %c0_i32 = arith.constant 0 : i32
    %c0_i32_0 = arith.constant 0 : i32
    return %arg0, %c0_i32 : i32, i32
  }
  func.func @transform_1(%arg0: i32) -> (i32, i32) {
    %c0_i32 = arith.constant 0 : i32
    %c0_i32_0 = arith.constant 0 : i32
    %c0_i32_1 = arith.constant 0 : i32
    return %c0_i32, %c0_i32_0 : i32, i32
  }
  func.func @transform_2(%arg0: i32) -> (i32, i32) {
    %c0_i32 = arith.constant 0 : i32
    %c0_i32_0 = arith.constant 0 : i32
    %c0_i32_1 = arith.constant 0 : i32
    return %c0_i32, %c0_i32_0 : i32, i32
  }
  func.func @transform_3(%arg0: i32) -> (i32, i32) {
    %c0_i32 = arith.constant 0 : i32
    %c0_i32_0 = arith.constant 0 : i32
    return %arg0, %c0_i32 : i32, i32
  }
  func.func @transform_4(%arg0: i32) -> (i32, i32) {
    %c0_i32 = arith.constant 0 : i32
    %c0_i32_0 = arith.constant 0 : i32
    return %arg0, %c0_i32 : i32, i32
  }
  func.func @transform_5(%arg0: i32) -> (i32, i32) {
    %c0_i32 = arith.constant 0 : i32
    %c0_i32_0 = arith.constant 0 : i32
    return %arg0, %c0_i32 : i32, i32
  }
  func.func @transform_6(%arg0: i32) -> (i32, i32) {
    %c0_i32 = arith.constant 0 : i32
    %c0_i32_0 = arith.constant 0 : i32
    return %arg0, %c0_i32 : i32, i32
  }
}

</mosaic_0001>

<bundles_post_ra>
// kernel: tpu_custom_call.1
= control target key start
LH: loop header
LB: loop body
LE: loop exit
PB: predicated region body
PF: predicated region fallthrough
CT: control target
= control target key end

     0   :  { %12 = vsyncpa [#allocation3], 0  ;;  %s548_s0 = inlined_call_operand.hbm [shape: f32[16,128], index: 0, kind: input, shape index: {}]   ;;  %s549_s1 = inlined_call_operand.hbm [shape: f32[128,256], index: 1, kind: input, shape index: {}]   ;;  %s550_s2 = inlined_call_operand.hbm [shape: f32[1,256], index: 2, kind: input, shape index: {}]   ;;  %s551_s3 = inlined_call_operand.hbm [shape: f32[16,128], index: 3, kind: input, shape index: {}]   ;;  %s552_s4 = inlined_call_operand.hbm [shape: f32[16,128], index: 4, kind: output, shape index: {0}]   ;;  %s553_s5 = inlined_call_operand.hbm [shape: f32[16,128], index: 5, kind: output, shape index: {1}]   ;;  %s554_s6 = inlined_call_operand.hbm [shape: f32[16,128], index: 6, kind: output, shape index: {2}]  }
   0x1   :  { %13 = vsyncpa [#allocation6], 0 }
   0x2   :  { %14 = vsyncpa [#allocation9], 0 }
   0x3   :  { %15 = vsyncpa [#allocation4], 0  ;;  %s34_s23 = sshll.u32 %s549_s1, 4  ;;  %s35_s23 = int_to_ptr.hbm [resolvable:$true] %s34_s23 }
   0x4   :  { %16 = vsyncpa [#allocation12], 0  ;;  %s466_s24 = smov [#allocation5]   ;;  %s21_s28 = sshll.u32 %s548_s0, 4  ;;  %s22_s28 = int_to_ptr.hbm [resolvable:$true] %s21_s28 }
   0x5   :  { %s36_s25 = sshll.u32 %s466_s24, 4  ;;  %s467_s29 = smov 256   ;;  %s37_s25 = int_to_ptr.vmem [resolvable:$true] %s36_s25 }
   0x6   :  { %s468_s30 = smov 16   ;;  %s469_s7 = smov [#allocation2]  }
   0x7   :  { %42 = dma.hbm_to_vmem [thread:$0]  %s35_s23, 4096, %s37_s25, [#allocation6], %s467_s29, %s467_s29, %s468_s30  }
   0x8   :  { %s23_s8 = sshll.u32 %s469_s7, 4  ;;  %s470_s9 = smov 128   ;;  %s24_s8 = int_to_ptr.vmem [resolvable:$true] %s23_s8 }
   0x9   :  { %s471_s10 = smov 8   ;;  %s48_s12 = sshll.u32 %s550_s2, 4  ;;  %s49_s12 = int_to_ptr.hbm [resolvable:$true] %s48_s12 }
   0xa   :  { %29 = dma.hbm_to_vmem [thread:$0]  %s22_s28, 256, %s24_s8, [#allocation3], %s470_s9, %s470_s9, %s471_s10  }
   0xb   :  { %s472_s13 = smov [#allocation7]   ;;  %s58_s16 = sshll.u32 %s551_s3, 4  ;;  %s59_s16 = int_to_ptr.hbm [resolvable:$true] %s58_s16 }
   0xc   :  { %s50_s0 = sshll.u32 %s472_s13, 4  ;;  %s473_s17 = smov [#allocation8]   ;;  %s51_s0 = int_to_ptr.vmem [resolvable:$true] %s50_s0 }
   0xd   :  { %53 = dma.hbm_to_vmem [thread:$0]  %s49_s12, 32, %s51_s0, [#allocation6]  }
   0xe   :  { %s60_s18 = sshll.u32 %s473_s17, 4  ;;  %s61_s18 = int_to_ptr.vmem [resolvable:$true] %s60_s18 }
   0xf   :  { %66 = dma.hbm_to_vmem [thread:$0]  %s59_s16, 256, %s61_s18, [#allocation9], %s470_s9, %s470_s9, %s471_s10  }
  0x10   :  { %456 = dma.done.wait [#allocation3], 256  }
  0x11   :  { %457 = vsyncadd [#allocation3], 4294967040 }
  0x12   :  { %458 = dma.done.wait [#allocation6], 4128  }
  0x13   :  { %459 = vsyncadd [#allocation6], 4294963168 }
  0x14   :  { %460 = dma.done.wait [#allocation9], 256  }
  0x15   :  { %461 = vsyncadd [#allocation9], 4294967040  ;;  %v116_v0 = vld [vmem:[#allocation5 + $0xf8] sm:$0xff]  ;;  %v114_v1 = vld [vmem:[#allocation5 + $0xe8] sm:$0xff]  ;;  %s474_s2 = smov [#allocation11]   ;;  %s204_s21 = sshll.u32 %s553_s5, 4  ;;  %s205_s21 = int_to_ptr.hbm [resolvable:$true] %s204_s21 }
  0x16   :  { %257 = vmatpush.msra.mxu3 %v116_v0  ;;  %146 = vmatpush.msra.mxu1 %v116_v0  ;;  %v112_v2 = vld [vmem:[#allocation5 + $0xd8] sm:$0xff]  ;;  %v115_v3 = vld [vmem:[#allocation5 + $0xf0] sm:$0xff]  ;;  %v113_v4 = vld [vmem:[#allocation5 + $0xe0] sm:$0xff]  ;;  %s202_s3 = sshll.u32 %s474_s2, 4  ;;  %s475_s22 = smov [#allocation13]   ;;  %s203_s3 = int_to_ptr.vmem [resolvable:$true] %s202_s3 }
  0x17   :  { %v110_v5 = vld [vmem:[#allocation5 + $0xc8] sm:$0xff]  ;;  %241 = vmatpush.msra.mxu2 %v115_v3  ;;  %123 = vmatpush.msra.mxu0 %v115_v3  ;;  %v111_v6 = vld [vmem:[#allocation5 + $0xd0] sm:$0xff]  ;;  %v108_v7 = vld [vmem:[#allocation5 + $0xb8] sm:$0xff]  ;;  %s215_s23 = sshll.u32 %s475_s22, 4  ;;  %s217_s26 = sshll.u32 %s554_s6, 4  ;;  %s216_s23 = int_to_ptr.vmem [resolvable:$true] %s215_s23  ;;  %s218_s26 = int_to_ptr.hbm [resolvable:$true] %s217_s26 }
  0x18   :  { %258 = vmatpush.msra.mxu3 %v114_v1  ;;  %147 = vmatpush.msra.mxu1 %v114_v1  ;;  %v109_v8 = vld [vmem:[#allocation5 + $0xc0] sm:$0xff]  ;;  %v106_v9 = vld [vmem:[#allocation5 + $0xa8] sm:$0xff]  ;;  %v107_v10 = vld [vmem:[#allocation5 + $0xb0] sm:$0xff]  ;;  %s476_s5 = smov [#allocation10]   ;;  %s191_s29 = sshll.u32 %s552_s4, 4  ;;  %s192_s29 = int_to_ptr.hbm [resolvable:$true] %s191_s29 }
  0x19   :  { %242 = vmatpush.msra.mxu2 %v113_v4  ;;  %124 = vmatpush.msra.mxu0 %v113_v4  ;;  %v104_v11 = vld [vmem:[#allocation5 + $0x98] sm:$0xff]  ;;  %v105_v12 = vld [vmem:[#allocation5 + $0xa0] sm:$0xff]  ;;  %v102_v13 = vld [vmem:[#allocation5 + $0x88] sm:$0xff]  ;;  %s189_s6 = sshll.u32 %s476_s5, 4  ;;  %s190_s6 = int_to_ptr.vmem [resolvable:$true] %s189_s6 }
  0x1a   :  { %259 = vmatpush.msra.mxu3 %v112_v2  ;;  %148 = vmatpush.msra.mxu1 %v112_v2  ;;  %v103_v14 = vld [vmem:[#allocation5 + $0x90] sm:$0xff]  ;;  %v100_v15 = vld [vmem:[#allocation5 + $0x78] sm:$0xff]  ;;  %v101_v16 = vld [vmem:[#allocation5 + $0x80] sm:$0xff] }
  0x1b   :  { %243 = vmatpush.msra.mxu2 %v111_v6  ;;  %125 = vmatpush.msra.mxu0 %v111_v6  ;;  %v98_v17 = vld [vmem:[#allocation5 + $0x68] sm:$0xff]  ;;  %v99_v18 = vld [vmem:[#allocation5 + $0x70] sm:$0xff]  ;;  %v96_v19 = vld [vmem:[#allocation5 + $0x58] sm:$0xff] }
  0x1c   :  { %260 = vmatpush.msra.mxu3 %v110_v5  ;;  %149 = vmatpush.msra.mxu1 %v110_v5  ;;  %v97_v20 = vld [vmem:[#allocation5 + $0x60] sm:$0xff]  ;;  %v94_v21 = vld [vmem:[#allocation5 + $0x48] sm:$0xff]  ;;  %v95_v22 = vld [vmem:[#allocation5 + $0x50] sm:$0xff] }
  0x1d   :  { %244 = vmatpush.msra.mxu2 %v109_v8  ;;  %126 = vmatpush.msra.mxu0 %v109_v8  ;;  %v92_v23 = vld [vmem:[#allocation5 + $0x38] sm:$0xff]  ;;  %v93_v24 = vld [vmem:[#allocation5 + $0x40] sm:$0xff]  ;;  %v90_v25 = vld [vmem:[#allocation5 + $0x28] sm:$0xff] }
  0x1e   :  { %261 = vmatpush.msra.mxu3 %v108_v7  ;;  %150 = vmatpush.msra.mxu1 %v108_v7  ;;  %v91_v26 = vld [vmem:[#allocation5 + $0x30] sm:$0xff]  ;;  %v88_v27 = vld [vmem:[#allocation5 + $0x18] sm:$0xff]  ;;  %v89_v28 = vld [vmem:[#allocation5 + $0x20] sm:$0xff] }
  0x1f   :  { %245 = vmatpush.msra.mxu2 %v107_v10  ;;  %127 = vmatpush.msra.mxu0 %v107_v10  ;;  %v86_v29 = vld [vmem:[#allocation5 + $0x8] sm:$0xff]  ;;  %v84_v30 = vld [vmem:[#allocation2 + $0x8] sm:$0xff]  ;;  %v83_v31 = vld [vmem:[#allocation2] sm:$0xff] }
  0x20   :  { %262 = vmatpush.msra.mxu3 %v106_v9  ;;  %151 = vmatpush.msra.mxu1 %v106_v9  ;;  %v87_v32 = vld [vmem:[#allocation5 + $0x10] sm:$0xff]  ;;  %v85_v33 = vld [vmem:[#allocation5] sm:$0xff] }
  0x21   :  { %246 = vmatpush.msra.mxu2 %v105_v12  ;;  %128 = vmatpush.msra.mxu0 %v105_v12  ;;  %v117_v34 = vld [vmem:[#allocation7] sm:$0x3]  ;;  %v177_v45 = vld [vmem:[#allocation8] sm:$0xff]  ;;  %v178_v51 = vld [vmem:[#allocation8 + $0x8] sm:$0xff] }
  0x22   :  { %263 = vmatpush.msra.mxu3 %v104_v11  ;;  %152 = vmatpush.msra.mxu1 %v104_v11  ;;  %v120_v35 = vperm.slane %v117_v34, 1  ;;  %v119_v38 = vperm.slane %v117_v34, 0 }
  0x23   :  { %247 = vmatpush.msra.mxu2 %v103_v14  ;;  %129 = vmatpush.msra.mxu0 %v103_v14 }
  0x24   :  { %264 = vmatpush.msra.mxu3 %v102_v13  ;;  %153 = vmatpush.msra.mxu1 %v102_v13 }
  0x25   :  { %248 = vmatpush.msra.mxu2 %v101_v16  ;;  %130 = vmatpush.msra.mxu0 %v101_v16 }
  0x26   :  { %265 = vmatpush.msra.mxu3 %v100_v15  ;;  %154 = vmatpush.msra.mxu1 %v100_v15 }
  0x27   :  { %249 = vmatpush.msra.mxu2 %v99_v18  ;;  %131 = vmatpush.msra.mxu0 %v99_v18 }
  0x28   :  { %266 = vmatpush.msra.mxu3 %v98_v17  ;;  %155 = vmatpush.msra.mxu1 %v98_v17 }
  0x29   :  { %250 = vmatpush.msra.mxu2 %v97_v20  ;;  %132 = vmatpush.msra.mxu0 %v97_v20 }
  0x2a   :  { %267 = vmatpush.msra.mxu3 %v96_v19  ;;  %156 = vmatpush.msra.mxu1 %v96_v19 }
  0x2b   :  { %251 = vmatpush.msra.mxu2 %v95_v22  ;;  %133 = vmatpush.msra.mxu0 %v95_v22 }
  0x2c   :  { %268 = vmatpush.msra.mxu3 %v94_v21  ;;  %157 = vmatpush.msra.mxu1 %v94_v21 }
  0x2d   :  { %252 = vmatpush.msra.mxu2 %v93_v24  ;;  %134 = vmatpush.msra.mxu0 %v93_v24 }
  0x2e   :  { %269 = vmatpush.msra.mxu3 %v92_v23  ;;  %158 = vmatpush.msra.mxu1 %v92_v23 }
  0x2f   :  { %253 = vmatpush.msra.mxu2 %v91_v26  ;;  %135 = vmatpush.msra.mxu0 %v91_v26 }
  0x30   :  { %270 = vmatpush.msra.mxu3 %v90_v25  ;;  %159 = vmatpush.msra.mxu1 %v90_v25 }
  0x31   :  { %254 = vmatpush.msra.mxu2 %v89_v28  ;;  %136 = vmatpush.msra.mxu0 %v89_v28 }
  0x32   :  { %271 = vmatpush.msra.mxu3 %v88_v27  ;;  %160 = vmatpush.msra.mxu1 %v88_v27 }
  0x33   :  { %255 = vmatpush.msra.mxu2 %v87_v32  ;;  %137 = vmatpush.msra.mxu0 %v87_v32 }
  0x34   :  { %272 = vmatpush.msra.mxu3 %v86_v29  ;;  %161 = vmatpush.msra.mxu1 %v86_v29 }
  0x35   :  { %165 = vmatmul.f32.vlgmr.msra.gmra.mxu3 %v84_v30  ;;  %162 = vmatmul.f32.vlgmr.msra.gmra.mxu1 %v83_v31 }
  0x36   :  { %256 = vmatpush.msra.mxu2 %v85_v33  ;;  %138 = vmatpush.msra.mxu0 %v85_v33 }
  0x37   :  { %142 = vmatmul.f32.vlgmr.msra.gmra.mxu2 %v84_v30  ;;  %139 = vmatmul.f32.vlgmr.msra.gmra.mxu0 %v83_v31 }
  0xb2   :  { %v163_v36 = vpop.f32.mrf.mxu1 }
  0xb3   :  { %v164_v37 = vadd.f32 %v163_v36, %v120_v35 }
  0xb4   :  { %v140_v40 = vpop.f32.mrf.mxu0 }
  0xb5   :  { %171 = vst [vmem:[#allocation13] sm:$0xff] %v164_v37  ;;  %v173_v39 = vmul.f32 1.442695, %v164_v37  ;;  %v141_v41 = vadd.f32 %v140_v40, %v119_v38 }
  0xb7   :  { %284 = vpow2.f32 %v173_v39  ;;  %169 = vst [vmem:[#allocation11] sm:$0xff] %v141_v41 }
  0xb8   :  { %v166_v42 = vpop.f32.mrf.mxu3 }
  0xb9   :  { %v167_v43 = vadd.f32 %v166_v42, %v120_v35 }
  0xba   :  { %v143_v46 = vpop.f32.mrf.mxu2 }
  0xbb   :  { %172 = vst [vmem:[#allocation13 + $0x8] sm:$0xff] %v167_v43  ;;  %v175_v44 = vmul.f32 1.442695, %v167_v43  ;;  %v144_v48 = vadd.f32 %v143_v46, %v119_v38 }
  0xbd   :  { %v285_v47 = vpop.eup %284  ;;  %286 = vpow2.f32 %v175_v44  ;;  %170 = vst [vmem:[#allocation11 + $0x8] sm:$0xff] %v144_v48 }
  0xbe   :  { %v179_v49 = vmul.f32 %v285_v47, %v177_v45  ;;  %210 = dma.vmem_to_hbm [thread:$0]  %s203_s3, 256, %s205_s21, [#allocation12], %s470_s9, %s470_s9, %s471_s10  }
  0xbf   :  { %223 = dma.vmem_to_hbm [thread:$0]  %s216_s23, 256, %s218_s26, [#allocation12], %s470_s9, %s470_s9, %s471_s10  }
  0xc0   :  { %v181_v50 = vadd.f32 %v179_v49, %v141_v41 }
  0xc2   :  { %183 = vst [vmem:[#allocation10] sm:$0xff] %v181_v50 }
  0xc3   :  { %v287_v52 = vpop.eup %286 }
  0xc4   :  { %v180_v53 = vmul.f32 %v287_v52, %v178_v51 }
  0xc6   :  { %v182_v54 = vadd.f32 %v180_v53, %v144_v48 }
  0xc8   :  { %184 = vst [vmem:[#allocation10 + $0x8] sm:$0xff] %v182_v54 }
  0xc9   :  { %197 = dma.vmem_to_hbm [thread:$0]  %s190_s6, 256, %s192_s29, [#allocation4], %s470_s9, %s470_s9, %s471_s10  }
  0xca   :  { %462 = dma.done.wait [#allocation4], 256  }
  0xcb   :  { %463 = vsyncadd [#allocation4], 4294967040 }
  0xcc   :  { %464 = dma.done.wait [#allocation12], 512  }
  0xcd   :  { %465 = vsyncadd [#allocation12], 4294966784 }
  0xce   :  { %236 = vsyncpa [#allocation3], 1 }
  0xcf   :  { %237 = vsyncpa [#allocation6], 1 }
  0xd0   :  { %238 = vsyncpa [#allocation9], 1 }
  0xd1   :  { %239 = vsyncpa [#allocation4], 1 }
  0xd2   :  { %240 = vsyncpa [#allocation12], 1 }

</bundles_post_ra>
